<compile_context>
chip_gen: v7x
topology: tpu7x:2x2x1
jax: 0.10.0
libtpu: 0.0.40
codegen_flags: <defaults>
</compile_context>

<pallas_src>
import functools
import math

import jax
import jax.numpy as jnp
from jax.experimental import pallas as pl
from jax.experimental.pallas import tpu as pltpu

EPS = 1e-5          # BatchNorm1d default eps
NEG_SLOPE = 0.01    # nn.LeakyReLU default negative_slope
LANE = 128
SUBLANE = 8
VMEM_BUDGET = 24 * 1024 * 1024   # fused-path working-set budget (bytes)


# ---------------------------------------------------------------------------
# small helpers
# ---------------------------------------------------------------------------
def _round_up(x, m):
    return ((x + m - 1) // m) * m


def _pad2(a, rows, cols):
    return jnp.pad(a, ((0, rows - a.shape[0]), (0, cols - a.shape[1])))


def _leaky_relu(x):
    return jnp.where(x >= 0, x, NEG_SLOPE * x)


def _partial_stats(y, n_rows):
    """Masked per-tile [sum ; sum_of_squares] over the row axis -> [2, D]."""
    tm = y.shape[0]
    row = pl.program_id(0) * tm + jax.lax.broadcasted_iota(jnp.int32, (tm, 1), 0)
    ym = jnp.where(row < n_rows, y, 0.0)
    return jnp.concatenate(
        [jnp.sum(ym, axis=0, keepdims=True),
         jnp.sum(ym * ym, axis=0, keepdims=True)],
        axis=0,
    )


def _compiler_params(parallel=True):
    return pltpu.CompilerParams(
        dimension_semantics=(("parallel",) if parallel else ("arbitrary",)),
        vmem_limit_bytes=32 * 1024 * 1024,      # explicit; safe on v5e/v6e/v7x
    )


def _row_spec(tm, cols):
    return pl.BlockSpec((tm, cols), lambda i: (i, 0))


def _bcast_spec(cols):
    return pl.BlockSpec((1, cols), lambda i: (0, 0))


def _full_spec(rows, cols):
    return pl.BlockSpec((rows, cols), lambda i: (0, 0))


def _stats_spec(cols):
    return pl.BlockSpec((None, 2, cols), lambda i: (i, 0, 0))


# ---------------------------------------------------------------------------
# fully-fused single-tile kernel (whole forward, one pallas_call)
# ---------------------------------------------------------------------------
def _make_fused_kernel(n_mid, n_rows):
    n_bn = n_mid + 2

    def kernel(*refs):
        x_ref = refs[0]
        w0_ref = refs[1]
        wm_refs = refs[2:2 + n_mid]
        g_refs = refs[2 + n_mid:2 + n_mid + n_bn]
        b_refs = refs[2 + n_mid + n_bn:2 + n_mid + 2 * n_bn]
        o_ref = refs[-1]

        tm = x_ref.shape[0]
        row = jax.lax.broadcasted_iota(jnp.int32, (tm, 1), 0)
        valid = row < n_rows

        def bn_train(y, g_ref, b_ref):
            # Training-mode BatchNorm1d with biased batch stats over the valid rows.
            ym = jnp.where(valid, y, 0.0)
            mean = jnp.sum(ym, axis=0, keepdims=True) * (1.0 / n_rows)
            var = jnp.maximum(
                jnp.sum(ym * ym, axis=0, keepdims=True) * (1.0 / n_rows) - mean * mean, 0.0)
            inv = jax.lax.rsqrt(var + EPS)
            scale = g_ref[...] * inv
            shift = b_ref[...] - mean * scale
            return y * scale + shift

        x1 = jnp.dot(x_ref[...], w0_ref[...], preferred_element_type=jnp.float32)
        t = _leaky_relu(bn_train(x1, g_refs[0], b_refs[0]))
        for j in range(n_mid):
            y = jnp.dot(t, wm_refs[j][...], preferred_element_type=jnp.float32)
            t = _leaky_relu(bn_train(y, g_refs[j + 1], b_refs[j + 1]))
        x2 = t + x1
        o_ref[...] = bn_train(x2, g_refs[-1], b_refs[-1])

    return kernel


def _fused_forward(x, w0, wms, gs, bs, *, n_rows):
    b8, in_p = x.shape
    d_p = w0.shape[1]
    n_mid = len(wms)
    flops = (2 * b8 * in_p * d_p + n_mid * 2 * b8 * d_p * d_p
             + (n_mid + 2) * 8 * b8 * d_p)
    bytes_acc = 4 * (b8 * in_p + in_p * d_p + n_mid * d_p * d_p
                     + 2 * (n_mid + 2) * d_p + b8 * d_p)
    in_specs = ([_full_spec(b8, in_p), _full_spec(in_p, d_p)]
                + [_full_spec(d_p, d_p) for _ in wms]
                + [_bcast_spec(d_p) for _ in gs]
                + [_bcast_spec(d_p) for _ in bs])
    return pl.pallas_call(
        _make_fused_kernel(n_mid, n_rows),
        grid=(1,),
        in_specs=in_specs,
        out_specs=_full_spec(b8, d_p),
        out_shape=jax.ShapeDtypeStruct((b8, d_p), jnp.float32),
        compiler_params=_compiler_params(parallel=False),
        cost_estimate=pl.CostEstimate(flops=flops, transcendentals=0,
                                      bytes_accessed=bytes_acc),
    )(x, w0, *wms, *gs, *bs)


# ---------------------------------------------------------------------------
# tiled-path kernels (one row tile per grid step)
# ---------------------------------------------------------------------------
def _linear_stats_kernel(x_ref, w_ref, y_ref, stats_ref, *, n_rows):
    # y = x @ W   (Linear bias dropped: cancelled by downstream BatchNorm)
    y = jnp.dot(x_ref[...], w_ref[...], preferred_element_type=jnp.float32)
    y_ref[...] = y
    stats_ref[...] = _partial_stats(y, n_rows)


def _bn_act_linear_stats_kernel(t_ref, scale_ref, shift_ref, w_ref, y_ref, stats_ref,
                                *, n_rows):
    # BN (pre-folded into scale/shift) -> LeakyReLU -> Linear, fused per row tile.
    h = _leaky_relu(t_ref[...] * scale_ref[...] + shift_ref[...])
    y = jnp.dot(h, w_ref[...], preferred_element_type=jnp.float32)
    y_ref[...] = y
    stats_ref[...] = _partial_stats(y, n_rows)


def _bn_act_residual_stats_kernel(t_ref, x1_ref, scale_ref, shift_ref, x2_ref, stats_ref,
                                  *, n_rows):
    # x2 = LeakyReLU(BN(t)) + x1, plus stats for the output BatchNorm.
    h = _leaky_relu(t_ref[...] * scale_ref[...] + shift_ref[...])
    x2 = h + x1_ref[...]
    x2_ref[...] = x2
    stats_ref[...] = _partial_stats(x2, n_rows)


def _bn_kernel(x_ref, scale_ref, shift_ref, o_ref):
    o_ref[...] = x_ref[...] * scale_ref[...] + shift_ref[...]


# ---------------------------------------------------------------------------
# tiled-path pallas_call wrappers
# ---------------------------------------------------------------------------
def _linear_stats(x, w, *, tm, n_tiles, n_rows):
    b_pad, k = x.shape
    d_p = w.shape[1]
    cost = pl.CostEstimate(
        flops=2 * b_pad * k * d_p,
        transcendentals=0,
        bytes_accessed=4 * (b_pad * k + k * d_p + b_pad * d_p + n_tiles * 2 * d_p))
    return pl.pallas_call(
        functools.partial(_linear_stats_kernel, n_rows=n_rows),
        grid=(n_tiles,),
        in_specs=[_row_spec(tm, k), _full_spec(k, d_p)],
        out_specs=[_row_spec(tm, d_p), _stats_spec(d_p)],
        out_shape=[jax.ShapeDtypeStruct((b_pad, d_p), jnp.float32),
                   jax.ShapeDtypeStruct((n_tiles, 2, d_p), jnp.float32)],
        compiler_params=_compiler_params(),
        cost_estimate=cost,
    )(x, w)


def _bn_act_linear_stats(t, scale, shift, w, *, tm, n_tiles, n_rows):
    b_pad, d_p = t.shape
    cost = pl.CostEstimate(
        flops=2 * b_pad * d_p * d_p + 4 * b_pad * d_p,
        transcendentals=0,
        bytes_accessed=4 * (2 * b_pad * d_p + d_p * d_p + n_tiles * 2 * d_p + 2 * d_p))
    return pl.pallas_call(
        functools.partial(_bn_act_linear_stats_kernel, n_rows=n_rows),
        grid=(n_tiles,),
        in_specs=[_row_spec(tm, d_p), _bcast_spec(d_p), _bcast_spec(d_p),
                  _full_spec(d_p, d_p)],
        out_specs=[_row_spec(tm, d_p), _stats_spec(d_p)],
        out_shape=[jax.ShapeDtypeStruct((b_pad, d_p), jnp.float32),
                   jax.ShapeDtypeStruct((n_tiles, 2, d_p), jnp.float32)],
        compiler_params=_compiler_params(),
        cost_estimate=cost,
    )(t, scale, shift, w)


def _bn_act_residual_stats(t, x1, scale, shift, *, tm, n_tiles, n_rows):
    b_pad, d_p = t.shape
    cost = pl.CostEstimate(
        flops=6 * b_pad * d_p,
        transcendentals=0,
        bytes_accessed=4 * (3 * b_pad * d_p + n_tiles * 2 * d_p + 2 * d_p))
    return pl.pallas_call(
        functools.partial(_bn_act_residual_stats_kernel, n_rows=n_rows),
        grid=(n_tiles,),
        in_specs=[_row_spec(tm, d_p), _row_spec(tm, d_p),
                  _bcast_spec(d_p), _bcast_spec(d_p)],
        out_specs=[_row_spec(tm, d_p), _stats_spec(d_p)],
        out_shape=[jax.ShapeDtypeStruct((b_pad, d_p), jnp.float32),
                   jax.ShapeDtypeStruct((n_tiles, 2, d_p), jnp.float32)],
        compiler_params=_compiler_params(),
        cost_estimate=cost,
    )(t, x1, scale, shift)


def _bn_apply(x, scale, shift, *, tm, n_tiles):
    b_pad, d_p = x.shape
    cost = pl.CostEstimate(
        flops=2 * b_pad * d_p,
        transcendentals=0,
        bytes_accessed=4 * (2 * b_pad * d_p + 2 * d_p))
    return pl.pallas_call(
        _bn_kernel,
        grid=(n_tiles,),
        in_specs=[_row_spec(tm, d_p), _bcast_spec(d_p), _bcast_spec(d_p)],
        out_specs=_row_spec(tm, d_p),
        out_shape=jax.ShapeDtypeStruct((b_pad, d_p), jnp.float32),
        compiler_params=_compiler_params(),
        cost_estimate=cost,
    )(x, scale, shift)


def _finalize_bn(partial_stats, gamma, beta, n_rows):
    """Reduce per-tile [sum, sumsq] -> BatchNorm folded (scale, shift), shape [1, D]."""
    sums = jnp.sum(partial_stats, axis=0)                       # [2, D]
    mean = sums[0] / n_rows                                     # biased (training-mode) stats
    var = jnp.maximum(sums[1] / n_rows - mean * mean, 0.0)
    inv = jax.lax.rsqrt(var + EPS)
    scale = gamma * inv                                         # [1, D]
    shift = beta - mean * scale                                 # [1, D]
    return scale, shift


# ---------------------------------------------------------------------------
# full forward
# ---------------------------------------------------------------------------
def res_linear_net_forward(inp, params, *, row_tile=256):
    """ResLinearNet.forward (batch_norm=True, training-mode BN), Pallas."""
    w_first = params["w_first"]
    w_mid = params["w_mid"]
    gammas = params["gammas"]
    betas = params["betas"]

    batch, f_in = inp.shape
    d = w_first.shape[1]
    in_p = _round_up(f_in, LANE)
    d_p = _round_up(d, LANE)
    n_mid = len(w_mid)

    gs = [_pad2(g.astype(jnp.float32), 1, d_p) for g in gammas]
    bs = [_pad2(b.astype(jnp.float32), 1, d_p) for b in betas]
    w0 = _pad2(w_first.astype(jnp.float32), in_p, d_p)
    wms = [_pad2(w.astype(jnp.float32), d_p, d_p) for w in w_mid]

    # --- fully-fused single-tile path (small batch) -------------------------------------
    b8 = _round_up(batch, SUBLANE)
    fused_bytes = 4 * (b8 * in_p + in_p * d_p + n_mid * d_p * d_p
                       + 2 * (n_mid + 2) * d_p + 6 * b8 * d_p)
    if b8 <= max(row_tile, SUBLANE) and fused_bytes <= VMEM_BUDGET:
        x = _pad2(inp.astype(jnp.float32), b8, in_p)
        out = _fused_forward(x, w0, wms, gs, bs, n_rows=batch)
        return out[:batch, :d]

    # --- general tiled path --------------------------------------------------------------
    tm = _round_up(row_tile, SUBLANE)
    b_pad = _round_up(batch, tm)
    n_tiles = b_pad // tm
    x = _pad2(inp.astype(jnp.float32), b_pad, in_p)

    # pass 1: x1 = first_linear(inp)  (+ batch stats of x1)
    x1, st = _linear_stats(x, w0, tm=tm, n_tiles=n_tiles, n_rows=batch)
    scale, shift = _finalize_bn(st, gs[0], bs[0], batch)

    # pass 2 (per middle layer): BN -> LeakyReLU -> Linear  (+ stats)
    t = x1
    for j, wm in enumerate(wms):
        t, st = _bn_act_linear_stats(t, scale, shift, wm,
                                     tm=tm, n_tiles=n_tiles, n_rows=batch)
        scale, shift = _finalize_bn(st, gs[j + 1], bs[j + 1], batch)

    # pass 3: x2 = sequential(x1) + x1  (+ stats for the output BN)
    x2, st = _bn_act_residual_stats(t, x1, scale, shift,
                                    tm=tm, n_tiles=n_tiles, n_rows=batch)
    scale, shift = _finalize_bn(st, gs[-1], bs[-1], batch)

    # pass 4: output_seq = final BatchNorm1d
    out = _bn_apply(x2, scale, shift, tm=tm, n_tiles=n_tiles)
    return out[:batch, :d]


# ---------------------------------------------------------------------------
# parameter init (mirrors ResLinearNet.__init__ / init_parameters)
# ---------------------------------------------------------------------------
def init_params(key, num_in_feats, num_out_feats, num_layers=3):
    """first_linear: PyTorch default init; middle Linear(s): orthogonal (init_parameters).
    Linear biases omitted (cancelled exactly by the downstream BatchNorms).
    last_linear is never used in forward -> not materialized."""
    orth = jax.nn.initializers.orthogonal()
    key, kf = jax.random.split(key)
    bound = 1.0 / math.sqrt(num_in_feats)
    w_first = jax.random.uniform(kf, (num_in_feats, num_out_feats), jnp.float32,
                                 -bound, bound)                 # stored pre-transposed [in, out]
    w_mid = []
    for _ in range(max(num_layers - 2, 0)):
        key, km = jax.random.split(key)
        w = orth(km, (num_out_feats, num_out_feats), jnp.float32)
        w_mid.append(jnp.transpose(w))                          # [in, out]
    gammas = [jnp.ones((1, num_out_feats), jnp.float32) for _ in range(num_layers)]
    betas = [jnp.zeros((1, num_out_feats), jnp.float32) for _ in range(num_layers)]
    return {"w_first": w_first, "w_mid": w_mid, "gammas": gammas, "betas": betas}


# ---------------------------------------------------------------------------
# pure-JAX reference (includes Linear biases to demonstrate exact BN cancellation)
# ---------------------------------------------------------------------------
def reference_forward(inp, params, b_first, b_mid):
    def bn(x, gamma, beta):
        mean = jnp.mean(x, axis=0, keepdims=True)
        var = jnp.mean((x - mean) ** 2, axis=0, keepdims=True)
        return (x - mean) * jax.lax.rsqrt(var + EPS) * gamma + beta

    x1 = inp @ params["w_first"] + b_first
    t = _leaky_relu(bn(x1, params["gammas"][0], params["betas"][0]))
    for j, w in enumerate(params["w_mid"]):
        t = _leaky_relu(bn(t @ w + b_mid[j],
                           params["gammas"][j + 1], params["betas"][j + 1]))
    x2 = t + x1
    return bn(x2, params["gammas"][-1], params["betas"][-1])


if __name__ == "__main__":
    NUM_IN = 16
    NUM_OUT = 32
    NUM_LAYERS = 3

    key = jax.random.PRNGKey(0)
    key, pk, bk = jax.random.split(key, 3)
    params = init_params(pk, NUM_IN, NUM_OUT, NUM_LAYERS)

    # Random Linear biases for the reference: the BatchNorms cancel them exactly,
    # so the (bias-free) kernel outputs must match.
    bkeys = jax.random.split(bk, 1 + max(NUM_LAYERS - 2, 0))
    b_first = 0.1 * jax.random.normal(bkeys[0], (NUM_OUT,), jnp.float32)
    b_mid = [0.1 * jax.random.normal(bkeys[1 + j], (NUM_OUT,), jnp.float32)
             for j in range(max(NUM_LAYERS - 2, 0))]

    fwd = jax.jit(res_linear_net_forward)

    # Test 1: small batch (odd size) -> fully-fused single-tile path, exercises row masking.
    key, xk1 = jax.random.split(key)
    inp_small = jax.random.normal(xk1, (50, NUM_IN), jnp.float32)
    out_small = fwd(inp_small, params)
    jax.block_until_ready(out_small)
    assert out_small.shape == (50, NUM_OUT)
    ref_small = reference_forward(inp_small, params, b_first, b_mid)
    err_small = float(jnp.max(jnp.abs(out_small - ref_small)))
    assert jnp.allclose(out_small, ref_small, rtol=2e-3, atol=2e-3), err_small

    # Test 2: larger batch -> tiled path (2 row tiles), exercises cross-tile BN reduction.
    key, xk2 = jax.random.split(key)
    inp_big = jax.random.normal(xk2, (512, NUM_IN), jnp.float32)
    out_big = fwd(inp_big, params)
    jax.block_until_ready(out_big)
    assert out_big.shape == (512, NUM_OUT)
    ref_big = reference_forward(inp_big, params, b_first, b_mid)
    err_big = float(jnp.max(jnp.abs(out_big - ref_big)))
    assert jnp.allclose(out_big, ref_big, rtol=2e-3, atol=2e-3), err_big

    print("KERNEL_OK")
</pallas_src>

<mosaic_0001>
module attributes {stable_mosaic.version = 11 : i64} {
  func.func @kernel(%arg0: i32, %arg1: memref<56x128xf32, #tpu.memory_space<vmem>>, %arg2: memref<128x128xf32, #tpu.memory_space<vmem>>, %arg3: memref<128x128xf32, #tpu.memory_space<vmem>>, %arg4: memref<1x128xf32, #tpu.memory_space<vmem>>, %arg5: memref<1x128xf32, #tpu.memory_space<vmem>>, %arg6: memref<1x128xf32, #tpu.memory_space<vmem>>, %arg7: memref<1x128xf32, #tpu.memory_space<vmem>>, %arg8: memref<1x128xf32, #tpu.memory_space<vmem>>, %arg9: memref<1x128xf32, #tpu.memory_space<vmem>>, %arg10: memref<56x128xf32, #tpu.memory_space<vmem>>) attributes {dimension_semantics = [#tpu.dimension_semantics<arbitrary>], iteration_bounds = array<i64: 1>, scalar_prefetch = 0 : i64, scratch_operands = 0 : i64, tpu.core_type = #tpu.core_type<tc>, window_params = [{pipeline_mode = #tpu.pipeline_mode<synchronous>, transform_indices = @transform_0, window_bounds = array<i64: 56, 128>}, {pipeline_mode = #tpu.pipeline_mode<synchronous>, transform_indices = @transform_1, window_bounds = array<i64: 128, 128>}, {pipeline_mode = #tpu.pipeline_mode<synchronous>, transform_indices = @transform_2, window_bounds = array<i64: 128, 128>}, {pipeline_mode = #tpu.pipeline_mode<synchronous>, transform_indices = @transform_3, window_bounds = array<i64: 1, 128>}, {pipeline_mode = #tpu.pipeline_mode<synchronous>, transform_indices = @transform_4, window_bounds = array<i64: 1, 128>}, {pipeline_mode = #tpu.pipeline_mode<synchronous>, transform_indices = @transform_5, window_bounds = array<i64: 1, 128>}, {pipeline_mode = #tpu.pipeline_mode<synchronous>, transform_indices = @transform_6, window_bounds = array<i64: 1, 128>}, {pipeline_mode = #tpu.pipeline_mode<synchronous>, transform_indices = @transform_7, window_bounds = array<i64: 1, 128>}, {pipeline_mode = #tpu.pipeline_mode<synchronous>, transform_indices = @transform_8, window_bounds = array<i64: 1, 128>}, {pipeline_mode = #tpu.pipeline_mode<synchronous>, transform_indices = @transform_9, window_bounds = array<i64: 56, 128>}]} {
    %0 = tpu.iota {dimensions = array<i32: 0>} : vector<56x1xi32>
    %c50_i32 = arith.constant 50 : i32
    %1 = vector.broadcast %c50_i32 : i32 to vector<56x1xi32>
    %2 = arith.cmpi slt, %0, %1 : vector<56x1xi32>
    %c0 = arith.constant 0 : index
    %c0_0 = arith.constant 0 : index
    %3 = vector.load %arg1[%c0, %c0_0] : memref<56x128xf32, #tpu.memory_space<vmem>>, vector<56x128xf32>
    %c0_1 = arith.constant 0 : index
    %c0_2 = arith.constant 0 : index
    %4 = vector.load %arg2[%c0_1, %c0_2] : memref<128x128xf32, #tpu.memory_space<vmem>>, vector<128x128xf32>
    %cst = arith.constant dense<0.000000e+00> : vector<56x128xf32>
    %5 = tpu.matmul %3, %4, %cst {dimension_numbers = #tpu.dot_dimension_numbers<[1], [0], [0], [1], [0, 0, 1, 1], [], []>} : vector<56x128xf32>, vector<128x128xf32>, vector<56x128xf32> -> vector<56x128xf32>
    %cst_3 = arith.constant 0.000000e+00 : f32
    %6 = vector.shape_cast %2 : vector<56x1xi1> to vector<56x1xi1>
    %7 = vector.broadcast %6 : vector<56x1xi1> to vector<56x128xi1>
    %8 = vector.broadcast %cst_3 : f32 to vector<56x128xf32>
    %9 = arith.select %7, %5, %8 : vector<56x128xi1>, vector<56x128xf32>
    %cst_4 = arith.constant dense<0.000000e+00> : vector<128xf32>
    %10 = vector.multi_reduction <add>, %9, %cst_4 [0] : vector<56x128xf32> to vector<128xf32>
    %11 = vector.shape_cast %10 : vector<128xf32> to vector<1x128xf32>
    %cst_5 = arith.constant 2.000000e-02 : f32
    %12 = vector.broadcast %cst_5 : f32 to vector<1x128xf32>
    %13 = arith.mulf %11, %12 : vector<1x128xf32>
    %14 = arith.mulf %9, %9 : vector<56x128xf32>
    %cst_6 = arith.constant dense<0.000000e+00> : vector<128xf32>
    %15 = vector.multi_reduction <add>, %14, %cst_6 [0] : vector<56x128xf32> to vector<128xf32>
    %16 = vector.shape_cast %15 : vector<128xf32> to vector<1x128xf32>
    %cst_7 = arith.constant 2.000000e-02 : f32
    %17 = vector.broadcast %cst_7 : f32 to vector<1x128xf32>
    %18 = arith.mulf %16, %17 : vector<1x128xf32>
    %19 = arith.mulf %13, %13 : vector<1x128xf32>
    %20 = arith.subf %18, %19 : vector<1x128xf32>
    %cst_8 = arith.constant 0.000000e+00 : f32
    %21 = vector.broadcast %cst_8 : f32 to vector<1x128xf32>
    %22 = arith.maximumf %20, %21 : vector<1x128xf32>
    %cst_9 = arith.constant 9.99999974E-6 : f32
    %23 = vector.broadcast %cst_9 : f32 to vector<1x128xf32>
    %24 = arith.addf %22, %23 : vector<1x128xf32>
    %25 = math.rsqrt %24 : vector<1x128xf32>
    %c0_10 = arith.constant 0 : index
    %c0_11 = arith.constant 0 : index
    %26 = vector.load %arg4[%c0_10, %c0_11] : memref<1x128xf32, #tpu.memory_space<vmem>>, vector<1x128xf32>
    %27 = arith.mulf %26, %25 : vector<1x128xf32>
    %c0_12 = arith.constant 0 : index
    %c0_13 = arith.constant 0 : index
    %28 = vector.load %arg7[%c0_12, %c0_13] : memref<1x128xf32, #tpu.memory_space<vmem>>, vector<1x128xf32>
    %29 = arith.mulf %13, %27 : vector<1x128xf32>
    %30 = arith.subf %28, %29 : vector<1x128xf32>
    %31 = vector.broadcast %27 : vector<1x128xf32> to vector<56x128xf32>
    %32 = arith.mulf %5, %31 : vector<56x128xf32>
    %33 = vector.broadcast %30 : vector<1x128xf32> to vector<56x128xf32>
    %34 = arith.addf %32, %33 : vector<56x128xf32>
    %cst_14 = arith.constant 0.000000e+00 : f32
    %35 = vector.broadcast %cst_14 : f32 to vector<56x128xf32>
    %36 = arith.cmpf oge, %34, %35 : vector<56x128xf32>
    %cst_15 = arith.constant 0.00999999977 : f32
    %37 = vector.broadcast %cst_15 : f32 to vector<56x128xf32>
    %38 = arith.mulf %37, %34 : vector<56x128xf32>
    %39 = arith.select %36, %34, %38 : vector<56x128xi1>, vector<56x128xf32>
    %c0_16 = arith.constant 0 : index
    %c0_17 = arith.constant 0 : index
    %40 = vector.load %arg3[%c0_16, %c0_17] : memref<128x128xf32, #tpu.memory_space<vmem>>, vector<128x128xf32>
    %cst_18 = arith.constant dense<0.000000e+00> : vector<56x128xf32>
    %41 = tpu.matmul %39, %40, %cst_18 {dimension_numbers = #tpu.dot_dimension_numbers<[1], [0], [0], [1], [0, 0, 1, 1], [], []>} : vector<56x128xf32>, vector<128x128xf32>, vector<56x128xf32> -> vector<56x128xf32>
    %cst_19 = arith.constant 0.000000e+00 : f32
    %42 = vector.shape_cast %2 : vector<56x1xi1> to vector<56x1xi1>
    %43 = vector.broadcast %42 : vector<56x1xi1> to vector<56x128xi1>
    %44 = vector.broadcast %cst_19 : f32 to vector<56x128xf32>
    %45 = arith.select %43, %41, %44 : vector<56x128xi1>, vector<56x128xf32>
    %cst_20 = arith.constant dense<0.000000e+00> : vector<128xf32>
    %46 = vector.multi_reduction <add>, %45, %cst_20 [0] : vector<56x128xf32> to vector<128xf32>
    %47 = vector.shape_cast %46 : vector<128xf32> to vector<1x128xf32>
    %cst_21 = arith.constant 2.000000e-02 : f32
    %48 = vector.broadcast %cst_21 : f32 to vector<1x128xf32>
    %49 = arith.mulf %47, %48 : vector<1x128xf32>
    %50 = arith.mulf %45, %45 : vector<56x128xf32>
    %cst_22 = arith.constant dense<0.000000e+00> : vector<128xf32>
    %51 = vector.multi_reduction <add>, %50, %cst_22 [0] : vector<56x128xf32> to vector<128xf32>
    %52 = vector.shape_cast %51 : vector<128xf32> to vector<1x128xf32>
    %cst_23 = arith.constant 2.000000e-02 : f32
    %53 = vector.broadcast %cst_23 : f32 to vector<1x128xf32>
    %54 = arith.mulf %52, %53 : vector<1x128xf32>
    %55 = arith.mulf %49, %49 : vector<1x128xf32>
    %56 = arith.subf %54, %55 : vector<1x128xf32>
    %cst_24 = arith.constant 0.000000e+00 : f32
    %57 = vector.broadcast %cst_24 : f32 to vector<1x128xf32>
    %58 = arith.maximumf %56, %57 : vector<1x128xf32>
    %cst_25 = arith.constant 9.99999974E-6 : f32
    %59 = vector.broadcast %cst_25 : f32 to vector<1x128xf32>
    %60 = arith.addf %58, %59 : vector<1x128xf32>
    %61 = math.rsqrt %60 : vector<1x128xf32>
    %c0_26 = arith.constant 0 : index
    %c0_27 = arith.constant 0 : index
    %62 = vector.load %arg5[%c0_26, %c0_27] : memref<1x128xf32, #tpu.memory_space<vmem>>, vector<1x128xf32>
    %63 = arith.mulf %62, %61 : vector<1x128xf32>
    %c0_28 = arith.constant 0 : index
    %c0_29 = arith.constant 0 : index
    %64 = vector.load %arg8[%c0_28, %c0_29] : memref<1x128xf32, #tpu.memory_space<vmem>>, vector<1x128xf32>
    %65 = arith.mulf %49, %63 : vector<1x128xf32>
    %66 = arith.subf %64, %65 : vector<1x128xf32>
    %67 = vector.broadcast %63 : vector<1x128xf32> to vector<56x128xf32>
    %68 = arith.mulf %41, %67 : vector<56x128xf32>
    %69 = vector.broadcast %66 : vector<1x128xf32> to vector<56x128xf32>
    %70 = arith.addf %68, %69 : vector<56x128xf32>
    %cst_30 = arith.constant 0.000000e+00 : f32
    %71 = vector.broadcast %cst_30 : f32 to vector<56x128xf32>
    %72 = arith.cmpf oge, %70, %71 : vector<56x128xf32>
    %cst_31 = arith.constant 0.00999999977 : f32
    %73 = vector.broadcast %cst_31 : f32 to vector<56x128xf32>
    %74 = arith.mulf %73, %70 : vector<56x128xf32>
    %75 = arith.select %72, %70, %74 : vector<56x128xi1>, vector<56x128xf32>
    %76 = arith.addf %75, %5 : vector<56x128xf32>
    %cst_32 = arith.constant 0.000000e+00 : f32
    %77 = vector.shape_cast %2 : vector<56x1xi1> to vector<56x1xi1>
    %78 = vector.broadcast %77 : vector<56x1xi1> to vector<56x128xi1>
    %79 = vector.broadcast %cst_32 : f32 to vector<56x128xf32>
    %80 = arith.select %78, %76, %79 : vector<56x128xi1>, vector<56x128xf32>
    %cst_33 = arith.constant dense<0.000000e+00> : vector<128xf32>
    %81 = vector.multi_reduction <add>, %80, %cst_33 [0] : vector<56x128xf32> to vector<128xf32>
    %82 = vector.shape_cast %81 : vector<128xf32> to vector<1x128xf32>
    %cst_34 = arith.constant 2.000000e-02 : f32
    %83 = vector.broadcast %cst_34 : f32 to vector<1x128xf32>
    %84 = arith.mulf %82, %83 : vector<1x128xf32>
    %85 = arith.mulf %80, %80 : vector<56x128xf32>
    %cst_35 = arith.constant dense<0.000000e+00> : vector<128xf32>
    %86 = vector.multi_reduction <add>, %85, %cst_35 [0] : vector<56x128xf32> to vector<128xf32>
    %87 = vector.shape_cast %86 : vector<128xf32> to vector<1x128xf32>
    %cst_36 = arith.constant 2.000000e-02 : f32
    %88 = vector.broadcast %cst_36 : f32 to vector<1x128xf32>
    %89 = arith.mulf %87, %88 : vector<1x128xf32>
    %90 = arith.mulf %84, %84 : vector<1x128xf32>
    %91 = arith.subf %89, %90 : vector<1x128xf32>
    %cst_37 = arith.constant 0.000000e+00 : f32
    %92 = vector.broadcast %cst_37 : f32 to vector<1x128xf32>
    %93 = arith.maximumf %91, %92 : vector<1x128xf32>
    %cst_38 = arith.constant 9.99999974E-6 : f32
    %94 = vector.broadcast %cst_38 : f32 to vector<1x128xf32>
    %95 = arith.addf %93, %94 : vector<1x128xf32>
    %96 = math.rsqrt %95 : vector<1x128xf32>
    %c0_39 = arith.constant 0 : index
    %c0_40 = arith.constant 0 : index
    %97 = vector.load %arg6[%c0_39, %c0_40] : memref<1x128xf32, #tpu.memory_space<vmem>>, vector<1x128xf32>
    %98 = arith.mulf %97, %96 : vector<1x128xf32>
    %c0_41 = arith.constant 0 : index
    %c0_42 = arith.constant 0 : index
    %99 = vector.load %arg9[%c0_41, %c0_42] : memref<1x128xf32, #tpu.memory_space<vmem>>, vector<1x128xf32>
    %100 = arith.mulf %84, %98 : vector<1x128xf32>
    %101 = arith.subf %99, %100 : vector<1x128xf32>
    %102 = vector.broadcast %98 : vector<1x128xf32> to vector<56x128xf32>
    %103 = arith.mulf %76, %102 : vector<56x128xf32>
    %104 = vector.broadcast %101 : vector<1x128xf32> to vector<56x128xf32>
    %105 = arith.addf %103, %104 : vector<56x128xf32>
    %c0_43 = arith.constant 0 : index
    %c0_44 = arith.constant 0 : index
    %106 = vector.load %arg10[%c0_43, %c0_44] : memref<56x128xf32, #tpu.memory_space<vmem>>, vector<56x128xf32>
    tpu.vector_store %arg10[%c0_43, %c0_44], %105 {strides = array<i32>} : memref<56x128xf32, #tpu.memory_space<vmem>>, vector<56x128xf32>,
    return
  }
  func.func @transform_0(%arg0: i32) -> (i32, i32) {
    %c0_i32 = arith.constant 0 : i32
    %c0_i32_0 = arith.constant 0 : i32
    %c0_i32_1 = arith.constant 0 : i32
    return %c0_i32, %c0_i32_0 : i32, i32
  }
  func.func @transform_1(%arg0: i32) -> (i32, i32) {
    %c0_i32 = arith.constant 0 : i32
    %c0_i32_0 = arith.constant 0 : i32
    %c0_i32_1 = arith.constant 0 : i32
    return %c0_i32, %c0_i32_0 : i32, i32
  }
  func.func @transform_2(%arg0: i32) -> (i32, i32) {
    %c0_i32 = arith.constant 0 : i32
    %c0_i32_0 = arith.constant 0 : i32
    %c0_i32_1 = arith.constant 0 : i32
    return %c0_i32, %c0_i32_0 : i32, i32
  }
  func.func @transform_3(%arg0: i32) -> (i32, i32) {
    %c0_i32 = arith.constant 0 : i32
    %c0_i32_0 = arith.constant 0 : i32
    %c0_i32_1 = arith.constant 0 : i32
    return %c0_i32, %c0_i32_0 : i32, i32
  }
  func.func @transform_4(%arg0: i32) -> (i32, i32) {
    %c0_i32 = arith.constant 0 : i32
    %c0_i32_0 = arith.constant 0 : i32
    %c0_i32_1 = arith.constant 0 : i32
    return %c0_i32, %c0_i32_0 : i32, i32
  }
  func.func @transform_5(%arg0: i32) -> (i32, i32) {
    %c0_i32 = arith.constant 0 : i32
    %c0_i32_0 = arith.constant 0 : i32
    %c0_i32_1 = arith.constant 0 : i32
    return %c0_i32, %c0_i32_0 : i32, i32
  }
  func.func @transform_6(%arg0: i32) -> (i32, i32) {
    %c0_i32 = arith.constant 0 : i32
    %c0_i32_0 = arith.constant 0 : i32
    %c0_i32_1 = arith.constant 0 : i32
    return %c0_i32, %c0_i32_0 : i32, i32
  }
  func.func @transform_7(%arg0: i32) -> (i32, i32) {
    %c0_i32 = arith.constant 0 : i32
    %c0_i32_0 = arith.constant 0 : i32
    %c0_i32_1 = arith.constant 0 : i32
    return %c0_i32, %c0_i32_0 : i32, i32
  }
  func.func @transform_8(%arg0: i32) -> (i32, i32) {
    %c0_i32 = arith.constant 0 : i32
    %c0_i32_0 = arith.constant 0 : i32
    %c0_i32_1 = arith.constant 0 : i32
    return %c0_i32, %c0_i32_0 : i32, i32
  }
  func.func @transform_9(%arg0: i32) -> (i32, i32) {
    %c0_i32 = arith.constant 0 : i32
    %c0_i32_0 = arith.constant 0 : i32
    %c0_i32_1 = arith.constant 0 : i32
    return %c0_i32, %c0_i32_0 : i32, i32
  }
}

</mosaic_0001>

<bundles_post_ra>
// kernel: res_linear_net_forward.1
= control target key start
LH: loop header
LB: loop body
LE: loop exit
PB: predicated region body
PF: predicated region fallthrough
CT: control target
= control target key end

     0   :  { %v797_v0 = vmov 0.0|0.0   ;;  %vm798_vm0 = vmmov 0   ;;  %v799_v4 = vmov 0.0   ;;  %s1114_s1 = inlined_call_operand.vmem [shape: f32[128,128], index: 1, kind: input, shape index: {}]   ;;  %s1115_s0 = inlined_call_operand.vmem [shape: f32[56,128], index: 0, kind: input, shape index: {}]   ;;  %s1116_s2 = inlined_call_operand.vmem [shape: f32[128,128], index: 2, kind: input, shape index: {}]   ;;  %s1117_s3 = inlined_call_operand.vmem [shape: f32[1,128], index: 3, kind: input, shape index: {}]   ;;  %s1118_s6 = inlined_call_operand.vmem [shape: f32[1,128], index: 6, kind: input, shape index: {}]   ;;  %s1119_s4 = inlined_call_operand.vmem [shape: f32[1,128], index: 4, kind: input, shape index: {}]   ;;  %s1120_s7 = inlined_call_operand.vmem [shape: f32[1,128], index: 7, kind: input, shape index: {}]   ;;  %s1121_s5 = inlined_call_operand.vmem [shape: f32[1,128], index: 5, kind: input, shape index: {}]   ;;  %s1122_s8 = inlined_call_operand.vmem [shape: f32[1,128], index: 8, kind: input, shape index: {}]   ;;  %s1123_s9 = inlined_call_operand.vmem [shape: f32[56,128], index: 9, kind: output, shape index: {}]  }
   0x1   :  { %740 = vmatprep.subr.bf16.mxu0 %v797_v0  ;;  %v54_v1 = vld [vmem:[%s1114_s1] sm:$0xff]  ;;  %v55_v2 = vld [vmem:[%s1114_s1 + $0x8] sm:$0xff]  ;;  %v56_v3 = vld [vmem:[%s1114_s1 + $0x10] sm:$0xff]  ;;  %666 = vmatprep.mubr.msk.f32.mxu0 %vm798_vm0, %v799_v4 }
   0x2   :  { %v741_v5 = vpack.c.bf16 %v55_v2, %v54_v1  ;;  %v57_v6 = vld [vmem:[%s1114_s1 + $0x18] sm:$0xff]  ;;  %764 = vmatprep.subr.bf16.mxu1 %v797_v0  ;;  %719 = vmatprep.mubr.msk.f32.mxu1 %vm798_vm0, %v799_v4  ;;  %v58_v8 = vld [vmem:[%s1114_s1 + $0x20] sm:$0xff]  ;;  %v59_v9 = vld [vmem:[%s1114_s1 + $0x28] sm:$0xff] }
   0x3   :  { %v744_v7 = vpack.c.bf16 %v57_v6, %v56_v3  ;;  %v747_v10 = vpack.c.bf16 %v59_v9, %v58_v8  ;;  %v60_v11 = vld [vmem:[%s1114_s1 + $0x30] sm:$0xff]  ;;  %v61_v12 = vld [vmem:[%s1114_s1 + $0x38] sm:$0xff]  ;;  %v62_v14 = vld [vmem:[%s1114_s1 + $0x40] sm:$0xff]  ;;  %v32_v6 = vlaneseq }
   0x4   :  { %742 = vmatpush3.bf16.msra.mxu0 %v741_v5  ;;  %v750_v13 = vpack.c.bf16 %v61_v12, %v60_v11  ;;  %v63_v15 = vld [vmem:[%s1114_s1 + $0x48] sm:$0xff]  ;;  %v64_v17 = vld [vmem:[%s1114_s1 + $0x50] sm:$0xff]  ;;  %v65_v18 = vld [vmem:[%s1114_s1 + $0x58] sm:$0xff] }
   0x5   :  { %743 = vmatprep.subr.bf16.mxu0 %v797_v0  ;;  %v753_v16 = vpack.c.bf16 %v63_v15, %v62_v14  ;;  %v756_v19 = vpack.c.bf16 %v65_v18, %v64_v17  ;;  %v66_v20 = vld [vmem:[%s1114_s1 + $0x60] sm:$0xff]  ;;  %v67_v21 = vld [vmem:[%s1114_s1 + $0x68] sm:$0xff]  ;;  %v68_v23 = vld [vmem:[%s1114_s1 + $0x70] sm:$0xff]  ;;  %v33_v12 = vshrl.u32 %v32_v6, 7 }
   0x6   :  { %v759_v22 = vpack.c.bf16 %v67_v21, %v66_v20  ;;  %v69_v24 = vld [vmem:[%s1114_s1 + $0x78] sm:$0xff]  ;;  %v47_v26 = vld [vmem:[%s1115_s0] sm:$0xff]  ;;  %v48_v27 = vld [vmem:[%s1115_s0 + $0x8] sm:$0xff] }
   0x7   :  { %v762_v25 = vpack.c.bf16 %v69_v24, %v68_v23  ;;  %v49_v28 = vld [vmem:[%s1115_s0 + $0x10] sm:$0xff]  ;;  %v50_v29 = vld [vmem:[%s1115_s0 + $0x18] sm:$0xff]  ;;  %v51_v30 = vld [vmem:[%s1115_s0 + $0x20] sm:$0xff]  ;;  %v1024_v18 = vadd.s32 48, %v33_v12 }
   0x8   :  { %745 = vmatpush3.bf16.msra.mxu0 %v744_v7  ;;  %v52_v31 = vld [vmem:[%s1115_s0 + $0x28] sm:$0xff]  ;;  %v53_v32 = vld [vmem:[%s1115_s0 + $0x30] sm:$0xff]  ;;  %v281_v33 = vld [vmem:[%s1116_s2] sm:$0xff] }
   0x9   :  { %746 = vmatprep.subr.bf16.mxu0 %v797_v0  ;;  %v282_v34 = vld [vmem:[%s1116_s2 + $0x8] sm:$0xff]  ;;  %v283_v36 = vld [vmem:[%s1116_s2 + $0x10] sm:$0xff]  ;;  %v284_v37 = vld [vmem:[%s1116_s2 + $0x18] sm:$0xff]  ;;  %vm46_vm1 = vcmp.lt.s32.totalorder %v1024_v18, 50 }
   0xa   :  { %v765_v35 = vpack.c.bf16 %v282_v34, %v281_v33  ;;  %v768_v38 = vpack.c.bf16 %v284_v37, %v283_v36  ;;  %v285_v39 = vld [vmem:[%s1116_s2 + $0x20] sm:$0xff]  ;;  %v286_v40 = vld [vmem:[%s1116_s2 + $0x28] sm:$0xff]  ;;  %v287_v42 = vld [vmem:[%s1116_s2 + $0x30] sm:$0xff] }
   0xb   :  { %v771_v41 = vpack.c.bf16 %v286_v40, %v285_v39  ;;  %v288_v43 = vld [vmem:[%s1116_s2 + $0x38] sm:$0xff]  ;;  %v289_v45 = vld [vmem:[%s1116_s2 + $0x40] sm:$0xff]  ;;  %v290_v46 = vld [vmem:[%s1116_s2 + $0x48] sm:$0xff] }
   0xc   :  { %748 = vmatpush3.bf16.msra.mxu0 %v747_v10  ;;  %766 = vmatpush3.bf16.msra.mxu1 %v765_v35  ;;  %v774_v44 = vpack.c.bf16 %v288_v43, %v287_v42  ;;  %v777_v47 = vpack.c.bf16 %v290_v46, %v289_v45  ;;  %v291_v48 = vld [vmem:[%s1116_s2 + $0x50] sm:$0xff]  ;;  %v292_v49 = vld [vmem:[%s1116_s2 + $0x58] sm:$0xff]  ;;  %v293_v51 = vld [vmem:[%s1116_s2 + $0x60] sm:$0xff] }
   0xd   :  { %749 = vmatprep.subr.bf16.mxu0 %v797_v0  ;;  %767 = vmatprep.subr.bf16.mxu1 %v797_v0  ;;  %v780_v50 = vpack.c.bf16 %v292_v49, %v291_v48  ;;  %v294_v52 = vld [vmem:[%s1116_s2 + $0x68] sm:$0xff]  ;;  %v295_v54 = vld [vmem:[%s1116_s2 + $0x70] sm:$0xff]  ;;  %v296_v55 = vld [vmem:[%s1116_s2 + $0x78] sm:$0xff] }
   0xe   :  { %v783_v53 = vpack.c.bf16 %v294_v52, %v293_v51  ;;  %v786_v56 = vpack.c.bf16 %v296_v55, %v295_v54  ;;  %v229_v49 = vld [vmem:[%s1117_s3] sm:$0x1] }
  0x10   :  { %751 = vmatpush3.bf16.msra.mxu0 %v750_v13  ;;  %769 = vmatpush3.bf16.msra.mxu1 %v768_v38 }
  0x11   :  { %752 = vmatprep.subr.bf16.mxu0 %v797_v0  ;;  %770 = vmatprep.subr.bf16.mxu1 %v797_v0 }
  0x14   :  { %754 = vmatpush3.bf16.msra.mxu0 %v753_v16  ;;  %772 = vmatpush3.bf16.msra.mxu1 %v771_v41 }
  0x15   :  { %755 = vmatprep.subr.bf16.mxu0 %v797_v0  ;;  %773 = vmatprep.subr.bf16.mxu1 %v797_v0 }
  0x18   :  { %757 = vmatpush3.bf16.msra.mxu0 %v756_v19  ;;  %775 = vmatpush3.bf16.msra.mxu1 %v774_v44 }
  0x19   :  { %758 = vmatprep.subr.bf16.mxu0 %v797_v0  ;;  %776 = vmatprep.subr.bf16.mxu1 %v797_v0 }
  0x1c   :  { %760 = vmatpush3.bf16.msra.mxu0 %v759_v22  ;;  %778 = vmatpush3.bf16.msra.mxu1 %v777_v47 }
  0x1d   :  { %761 = vmatprep.subr.bf16.mxu0 %v797_v0  ;;  %779 = vmatprep.subr.bf16.mxu1 %v797_v0 }
  0x20   :  { %763 = vmatpush3.bf16.msra.mxu0 %v762_v25  ;;  %781 = vmatpush3.bf16.msra.mxu1 %v780_v50  ;;  %v1040_v50 = vsub.s32 0, %v33_v12 }
  0x21   :  { %782 = vmatprep.subr.bf16.mxu1 %v797_v0 }
  0x23   :  { %667 = vmatmul.mubr.f32.vlgmr.msra.gmra.mrb[0].mxu0 %v47_v26 }
  0x24   :  { %669 = vmatprep.mubr.msk.f32.mxu0 %vm798_vm0, %v799_v4  ;;  %784 = vmatpush3.bf16.msra.mxu1 %v783_v53  ;;  %v231_v53 = vld [vmem:[%s1118_s6] sm:$0x1] }
  0x25   :  { %785 = vmatprep.subr.bf16.mxu1 %v797_v0 }
  0x27   :  { %670 = vmatmul.mubr.f32.gmra.mrb[2].mxu0 %v48_v27 }
  0x28   :  { %672 = vmatprep.mubr.msk.f32.mxu0 %vm798_vm0, %v799_v4  ;;  %787 = vmatpush3.bf16.msra.mxu1 %v786_v56 }
  0x2b   :  { %673 = vmatmul.mubr.f32.gmra.mrb[4].mxu0 %v49_v28 }
  0x2c   :  { %675 = vmatprep.mubr.msk.f32.mxu0 %vm798_vm0, %v799_v4 }
  0x2f   :  { %676 = vmatmul.mubr.f32.gmra.mrb[6].mxu0 %v50_v29 }
  0x30   :  { %678 = vmatprep.mubr.msk.f32.mxu0 %vm798_vm0, %v799_v4 }
  0x33   :  { %679 = vmatmul.mubr.f32.gmra.mrb[8].mxu0 %v51_v30 }
  0x34   :  { %681 = vmatprep.mubr.msk.f32.mxu0 %vm798_vm0, %v799_v4 }
  0x37   :  { %682 = vmatmul.mubr.f32.gmra.mrb[10].mxu0 %v52_v31 }
  0x38   :  { %684 = vmatprep.mubr.msk.f32.mxu0 %vm798_vm0, %v799_v4 }
  0x3b   :  { %685 = vmatmul.mubr.f32.gmra.mrb[12].mxu0 %v53_v32 }
  0xf6   :  { %v999_v57 = vpop.f32.mrb[0].mxu0 }
  0xf7   :  { %v668_v58 = vpop.f32.mrb[1].mxu0  ;;  %v204_v60 = vmul.f32 %v999_v57, %v999_v57 }
  0xfa   :  { %v1001_v59 = vpop.f32.mrb[2].mxu0 }
  0xfb   :  { %v191_v61 = vadd.f32 %v1001_v59, %v999_v57  ;;  %v205_v62 = vmul.f32 %v1001_v59, %v1001_v59  ;;  %v671_v63 = vpop.f32.mrb[3].mxu0 }
  0xfd   :  { %v211_v0 = vadd.f32 %v205_v62, %v204_v60 }
  0xfe   :  { %v1009_v1 = vpop.f32.mrb[4].mxu0 }
  0xff   :  { %v192_v2 = vadd.f32 %v191_v61, %v1009_v1  ;;  %v206_v3 = vmul.f32 %v1009_v1, %v1009_v1  ;;  %v674_v5 = vpop.f32.mrb[5].mxu0 }
 0x101   :  { %v212_v7 = vadd.f32 %v211_v0, %v206_v3 }
 0x102   :  { %v1014_v8 = vpop.f32.mrb[6].mxu0 }
 0x103   :  { %v193_v9 = vadd.f32 %v192_v2, %v1014_v8  ;;  %v207_v10 = vmul.f32 %v1014_v8, %v1014_v8  ;;  %v677_v11 = vpop.f32.mrb[7].mxu0 }
 0x105   :  { %v213_v13 = vadd.f32 %v212_v7, %v207_v10 }
 0x106   :  { %v1019_v14 = vpop.f32.mrb[8].mxu0 }
 0x107   :  { %v194_v15 = vadd.f32 %v193_v9, %v1019_v14  ;;  %v208_v16 = vmul.f32 %v1019_v14, %v1019_v14  ;;  %v680_v17 = vpop.f32.mrb[9].mxu0 }
 0x109   :  { %v214_v19 = vadd.f32 %v213_v13, %v208_v16 }
 0x10a   :  { %v1026_v20 = vpop.f32.mrb[10].mxu0 }
 0x10b   :  { %v195_v21 = vadd.f32 %v194_v15, %v1026_v20  ;;  %v209_v22 = vmul.f32 %v1026_v20, %v1026_v20  ;;  %v683_v23 = vpop.f32.mrb[11].mxu0 }
 0x10d   :  { %v215_v24 = vadd.f32 %v214_v19, %v209_v22 }
 0x10e   :  { %v1032_v25 = vpop.f32.mrb[12].mxu0 }
 0x10f   :  { %v190_v26 = vsel %vm46_vm1, %v1032_v25, 0.0  ;;  %v686_v27 = vpop.f32.mrb[13].mxu0 }
 0x110   :  { %v196_v28 = vadd.f32 %v195_v21, %v190_v26  ;;  %v210_v29 = vmul.f32 %v190_v26, %v190_v26 }
 0x112   :  { %v197_v30 = vrot.slane %v196_v28, 4  ;;  %v216_v31 = vadd.f32 %v215_v24, %v210_v29 }
 0x114   :  { %v198_v32 = vadd.f32 %v197_v30, %v196_v28  ;;  %v217_v33 = vrot.slane %v216_v31, 4 }
 0x116   :  { %v199_v34 = vrot.slane %v198_v32, 2  ;;  %v218_v35 = vadd.f32 %v217_v33, %v216_v31 }
 0x118   :  { %v200_v36 = vadd.f32 %v199_v34, %v198_v32  ;;  %v219_v37 = vrot.slane %v218_v35, 2 }
 0x11a   :  { %v201_v38 = vrot.slane %v200_v36, 1  ;;  %v220_v39 = vadd.f32 %v219_v37, %v218_v35 }
 0x11c   :  { %v202_v40 = vadd.f32 %v201_v38, %v200_v36  ;;  %v221_v41 = vrot.slane %v220_v39, 1 }
 0x11e   :  { %v203_v42 = vmul.f32 0.02, %v202_v40  ;;  %v222_v43 = vadd.f32 %v221_v41, %v220_v39 }
 0x120   :  { %v223_v44 = vmul.f32 0.02, %v222_v43  ;;  %v224_v45 = vmul.f32 %v203_v42, %v203_v42 }
 0x122   :  { %v225_v46 = vsub.f32 %v223_v44, %v224_v45 }
 0x124   :  { %v226_v47 = vmax.f32 %v225_v46, 0.0 }
 0x126   :  { %v227_v48 = vadd.f32 1e-05, %v226_v47 }
 0x128   :  { %791 = vrsqrt.f32 %v227_v48 }
 0x132   :  { %v792_v51 = vpop.eup %791 }
 0x133   :  { %v230_v52 = vmul.f32 %v792_v51, %v229_v49 }
 0x135   :  { %v232_v54 = vmul.f32 %v230_v52, %v203_v42  ;;  %v238_v55 = vrot.slane %v230_v52, %v1040_v50 }
 0x137   :  { %v233_v56 = vsub.f32 %v231_v53, %v232_v54  ;;  %v246_v58 = vmul.f32 %v238_v55, %v1032_v25  ;;  %v240_v60 = vmul.f32 %v238_v55, %v999_v57  ;;  %v241_v61 = vmul.f32 %v238_v55, %v1001_v59 }
 0x138   :  { %v242_v62 = vmul.f32 %v238_v55, %v1009_v1  ;;  %v243_v63 = vmul.f32 %v238_v55, %v1014_v8  ;;  %v244_v0 = vmul.f32 %v238_v55, %v1019_v14  ;;  %v245_v2 = vmul.f32 %v238_v55, %v1026_v20 }
 0x139   :  { %v251_v3 = vrot.slane %v233_v56, %v1040_v50 }
 0x13b   :  { %v259_v5 = vadd.f32 %v251_v3, %v246_v58  ;;  %v253_v6 = vadd.f32 %v251_v3, %v240_v60  ;;  %v254_v7 = vadd.f32 %v251_v3, %v241_v61  ;;  %v255_v9 = vadd.f32 %v251_v3, %v242_v62 }
 0x13c   :  { %v256_v10 = vadd.f32 %v251_v3, %v243_v63  ;;  %v257_v11 = vadd.f32 %v251_v3, %v244_v0  ;;  %v258_v12 = vadd.f32 %v251_v3, %v245_v2 }
 0x13d   :  { %vm260_vm2 = vcmp.ge.f32.partialorder %v253_v6, 0.0  ;;  %v267_v13 = vmul.f32 0.01, %v253_v6  ;;  %v268_v16 = vmul.f32 0.01, %v254_v7  ;;  %vm261_vm3 = vcmp.ge.f32.partialorder %v254_v7, 0.0 }
 0x13e   :  { %v269_v19 = vmul.f32 0.01, %v255_v9  ;;  %vm262_vm4 = vcmp.ge.f32.partialorder %v255_v9, 0.0  ;;  %v270_v22 = vmul.f32 0.01, %v256_v10  ;;  %vm263_vm5 = vcmp.ge.f32.partialorder %v256_v10, 0.0 }
 0x13f   :  { %v274_v15 = vsel %vm260_vm2, %v253_v6, %v267_v13  ;;  %v275_v17 = vsel %vm261_vm3, %v254_v7, %v268_v16  ;;  %v271_v24 = vmul.f32 0.01, %v257_v11  ;;  %vm264_vm6 = vcmp.ge.f32.partialorder %v257_v11, 0.0 }
 0x140   :  { %720 = vmatmul.mubr.f32.vlgmr.msra.gmra.mrb[0].mxu1 %v274_v15  ;;  %v276_v21 = vsel %vm262_vm4, %v255_v9, %v269_v19  ;;  %v277_v23 = vsel %vm263_vm5, %v256_v10, %v270_v22  ;;  %v272_v27 = vmul.f32 0.01, %v258_v12  ;;  %vm265_vm7 = vcmp.ge.f32.partialorder %v258_v12, 0.0 }
 0x141   :  { %722 = vmatprep.mubr.msk.f32.mxu1 %vm798_vm0, %v799_v4  ;;  %v278_v26 = vsel %vm264_vm6, %v257_v11, %v271_v24  ;;  %v273_v29 = vmul.f32 0.01, %v259_v5  ;;  %vm266_vm8 = vcmp.ge.f32.partialorder %v259_v5, 0.0 }
 0x142   :  { %v279_v28 = vsel %vm265_vm7, %v258_v12, %v272_v27 }
 0x143   :  { %v280_v30 = vsel %vm266_vm8, %v259_v5, %v273_v29 }
 0x144   :  { %723 = vmatmul.mubr.f32.gmra.mrb[2].mxu1 %v275_v17 }
 0x145   :  { %725 = vmatprep.mubr.msk.f32.mxu1 %vm798_vm0, %v799_v4 }
 0x148   :  { %726 = vmatmul.mubr.f32.gmra.mrb[4].mxu1 %v276_v21 }
 0x149   :  { %728 = vmatprep.mubr.msk.f32.mxu1 %vm798_vm0, %v799_v4 }
 0x14c   :  { %729 = vmatmul.mubr.f32.gmra.mrb[6].mxu1 %v277_v23 }
 0x14d   :  { %731 = vmatprep.mubr.msk.f32.mxu1 %vm798_vm0, %v799_v4 }
 0x150   :  { %732 = vmatmul.mubr.f32.gmra.mrb[8].mxu1 %v278_v26 }
 0x151   :  { %734 = vmatprep.mubr.msk.f32.mxu1 %vm798_vm0, %v799_v4 }
 0x154   :  { %735 = vmatmul.mubr.f32.gmra.mrb[10].mxu1 %v279_v28  ;;  %v442_v28 = vld [vmem:[%s1119_s4] sm:$0x1] }
 0x155   :  { %737 = vmatprep.mubr.msk.f32.mxu1 %vm798_vm0, %v799_v4 }
 0x158   :  { %738 = vmatmul.mubr.f32.gmra.mrb[12].mxu1 %v280_v30 }
 0x213   :  { %v363_v31 = vpop.f32.mrb[0].mxu1 }
 0x214   :  { %v721_v32 = vpop.f32.mrb[1].mxu1  ;;  %v417_v34 = vmul.f32 %v363_v31, %v363_v31 }
 0x215   :  { %v444_v32 = vld [vmem:[%s1120_s7] sm:$0x1] }
 0x217   :  { %v368_v33 = vpop.f32.mrb[2].mxu1 }
 0x218   :  { %v404_v35 = vadd.f32 %v368_v33, %v363_v31  ;;  %v418_v36 = vmul.f32 %v368_v33, %v368_v33  ;;  %v724_v37 = vpop.f32.mrb[3].mxu1 }
 0x21a   :  { %v424_v38 = vadd.f32 %v418_v36, %v417_v34 }
 0x21b   :  { %v373_v39 = vpop.f32.mrb[4].mxu1 }
 0x21c   :  { %v405_v40 = vadd.f32 %v404_v35, %v373_v39  ;;  %v419_v41 = vmul.f32 %v373_v39, %v373_v39  ;;  %v727_v42 = vpop.f32.mrb[5].mxu1 }
 0x21e   :  { %v425_v43 = vadd.f32 %v424_v38, %v419_v41 }
 0x21f   :  { %v378_v44 = vpop.f32.mrb[6].mxu1 }
 0x220   :  { %v406_v45 = vadd.f32 %v405_v40, %v378_v44  ;;  %v420_v46 = vmul.f32 %v378_v44, %v378_v44  ;;  %v730_v47 = vpop.f32.mrb[7].mxu1 }
 0x222   :  { %v426_v4 = vadd.f32 %v425_v43, %v420_v46 }
 0x223   :  { %v383_v48 = vpop.f32.mrb[8].mxu1 }
 0x224   :  { %v407_v49 = vadd.f32 %v406_v45, %v383_v48  ;;  %v421_v51 = vmul.f32 %v383_v48, %v383_v48  ;;  %v733_v52 = vpop.f32.mrb[9].mxu1 }
 0x226   :  { %v427_v53 = vadd.f32 %v426_v4, %v421_v51 }
 0x227   :  { %v388_v54 = vpop.f32.mrb[10].mxu1 }
 0x228   :  { %v408_v55 = vadd.f32 %v407_v49, %v388_v54  ;;  %v422_v56 = vmul.f32 %v388_v54, %v388_v54  ;;  %v736_v58 = vpop.f32.mrb[11].mxu1 }
 0x22a   :  { %v428_v60 = vadd.f32 %v427_v53, %v422_v56 }
 0x22b   :  { %v393_v61 = vpop.f32.mrb[12].mxu1 }
 0x22c   :  { %v403_v62 = vsel %vm46_vm1, %v393_v61, 0.0  ;;  %v739_v63 = vpop.f32.mrb[13].mxu1 }
 0x22d   :  { %v409_v0 = vadd.f32 %v408_v55, %v403_v62  ;;  %v423_v2 = vmul.f32 %v403_v62, %v403_v62 }
 0x22f   :  { %v410_v3 = vrot.slane %v409_v0, 4  ;;  %v429_v5 = vadd.f32 %v428_v60, %v423_v2 }
 0x231   :  { %v411_v6 = vadd.f32 %v410_v3, %v409_v0  ;;  %v430_v7 = vrot.slane %v429_v5, 4 }
 0x233   :  { %v412_v9 = vrot.slane %v411_v6, 2  ;;  %v431_v10 = vadd.f32 %v430_v7, %v429_v5 }
 0x235   :  { %v413_v11 = vadd.f32 %v412_v9, %v411_v6  ;;  %v432_v12 = vrot.slane %v431_v10, 2 }
 0x237   :  { %v414_v13 = vrot.slane %v413_v11, 1  ;;  %v433_v15 = vadd.f32 %v432_v12, %v431_v10 }
 0x239   :  { %v415_v16 = vadd.f32 %v414_v13, %v413_v11  ;;  %v434_v17 = vrot.slane %v433_v15, 1 }
 0x23b   :  { %v416_v19 = vmul.f32 0.02, %v415_v16  ;;  %v435_v21 = vadd.f32 %v434_v17, %v433_v15 }
 0x23d   :  { %v436_v22 = vmul.f32 0.02, %v435_v21  ;;  %v437_v23 = vmul.f32 %v416_v19, %v416_v19 }
 0x23f   :  { %v438_v24 = vsub.f32 %v436_v22, %v437_v23 }
 0x241   :  { %v439_v26 = vmax.f32 %v438_v24, 0.0 }
 0x243   :  { %v440_v27 = vadd.f32 1e-05, %v439_v26 }
 0x245   :  { %793 = vrsqrt.f32 %v440_v27 }
 0x24f   :  { %v794_v29 = vpop.eup %793 }
 0x250   :  { %v443_v30 = vmul.f32 %v794_v29, %v442_v28 }
 0x252   :  { %v445_v34 = vmul.f32 %v443_v30, %v416_v19  ;;  %v451_v35 = vrot.slane %v443_v30, %v1040_v50 }
 0x254   :  { %v446_v36 = vsub.f32 %v444_v32, %v445_v34  ;;  %v453_v37 = vmul.f32 %v451_v35, %v363_v31  ;;  %v454_v38 = vmul.f32 %v451_v35, %v368_v33  ;;  %v455_v40 = vmul.f32 %v451_v35, %v373_v39 }
 0x255   :  { %v456_v41 = vmul.f32 %v451_v35, %v378_v44  ;;  %v457_v42 = vmul.f32 %v451_v35, %v383_v48  ;;  %v458_v43 = vmul.f32 %v451_v35, %v388_v54  ;;  %v459_v45 = vmul.f32 %v451_v35, %v393_v61 }
 0x256   :  { %v464_v46 = vrot.slane %v446_v36, %v1040_v50 }
 0x258   :  { %v466_v47 = vadd.f32 %v464_v46, %v453_v37  ;;  %v467_v4 = vadd.f32 %v464_v46, %v454_v38  ;;  %v468_v49 = vadd.f32 %v464_v46, %v455_v40  ;;  %v469_v51 = vadd.f32 %v464_v46, %v456_v41 }
 0x259   :  { %v470_v52 = vadd.f32 %v464_v46, %v457_v42  ;;  %v471_v53 = vadd.f32 %v464_v46, %v458_v43  ;;  %v472_v55 = vadd.f32 %v464_v46, %v459_v45 }
 0x25a   :  { %vm473_vm9 = vcmp.ge.f32.partialorder %v466_v47, 0.0  ;;  %vm474_vm10 = vcmp.ge.f32.partialorder %v467_v4, 0.0  ;;  %vm475_vm11 = vcmp.ge.f32.partialorder %v468_v49, 0.0  ;;  %vm476_vm12 = vcmp.ge.f32.partialorder %v469_v51, 0.0 }
 0x25b   :  { %vm477_vm13 = vcmp.ge.f32.partialorder %v470_v52, 0.0  ;;  %vm478_vm14 = vcmp.ge.f32.partialorder %v471_v53, 0.0  ;;  %vm479_vm15 = vcmp.ge.f32.partialorder %v472_v55, 0.0  ;;  %v480_v31 = vmul.f32 0.01, %v466_v47 }
 0x25c   :  { %v481_v33 = vmul.f32 0.01, %v467_v4  ;;  %v482_v39 = vmul.f32 0.01, %v468_v49  ;;  %v483_v44 = vmul.f32 0.01, %v469_v51 }
 0x25d   :  { %v484_v48 = vmul.f32 0.01, %v470_v52  ;;  %v485_v54 = vmul.f32 0.01, %v471_v53  ;;  %v486_v56 = vmul.f32 0.01, %v472_v55  ;;  %v487_v58 = vsel %vm473_vm9, %v466_v47, %v480_v31 }
 0x25e   :  { %v488_v60 = vsel %vm474_vm10, %v467_v4, %v481_v33  ;;  %v489_v61 = vsel %vm475_vm11, %v468_v49, %v482_v39  ;;  %v490_v62 = vsel %vm476_vm12, %v469_v51, %v483_v44  ;;  %v494_v63 = vadd.f32 %v487_v58, %v999_v57  ;;  %v546_v51 = vld [vmem:[%s1121_s5] sm:$0x1] }
 0x25f   :  { %v491_v0 = vsel %vm477_vm13, %v470_v52, %v484_v48  ;;  %v492_v2 = vsel %vm478_vm14, %v471_v53, %v485_v54  ;;  %v493_v3 = vsel %vm479_vm15, %v472_v55, %v486_v56  ;;  %v495_v5 = vadd.f32 %v488_v60, %v1001_v59  ;;  %v548_v55 = vld [vmem:[%s1122_s8] sm:$0x1] }
 0x260   :  { %v496_v6 = vadd.f32 %v489_v61, %v1009_v1  ;;  %v497_v7 = vadd.f32 %v490_v62, %v1014_v8  ;;  %v498_v9 = vadd.f32 %v491_v0, %v1019_v14  ;;  %v499_v10 = vadd.f32 %v492_v2, %v1026_v20 }
 0x261   :  { %v500_v11 = vadd.f32 %v493_v3, %v1032_v25  ;;  %v508_v12 = vadd.f32 %v495_v5, %v494_v63  ;;  %v521_v13 = vmul.f32 %v494_v63, %v494_v63  ;;  %v522_v15 = vmul.f32 %v495_v5, %v495_v5 }
 0x262   :  { %v523_v57 = vmul.f32 %v496_v6, %v496_v6  ;;  %v524_v21 = vmul.f32 %v497_v7, %v497_v7  ;;  %v525_v23 = vmul.f32 %v498_v9, %v498_v9  ;;  %v526_v24 = vmul.f32 %v499_v10, %v499_v10 }
 0x263   :  { %v509_v16 = vadd.f32 %v508_v12, %v496_v6  ;;  %v528_v17 = vadd.f32 %v522_v15, %v521_v13  ;;  %v507_v8 = vsel %vm46_vm1, %v500_v11, 0.0 }
 0x264   :  { %v527_v25 = vmul.f32 %v507_v8, %v507_v8 }
 0x265   :  { %v510_v19 = vadd.f32 %v509_v16, %v497_v7  ;;  %v529_v22 = vadd.f32 %v528_v17, %v523_v57 }
 0x267   :  { %v511_v59 = vadd.f32 %v510_v19, %v498_v9  ;;  %v530_v1 = vadd.f32 %v529_v22, %v524_v21 }
 0x269   :  { %v512_v14 = vadd.f32 %v511_v59, %v499_v10  ;;  %v531_v20 = vadd.f32 %v530_v1, %v525_v23 }
 0x26b   :  { %v513_v26 = vadd.f32 %v512_v14, %v507_v8  ;;  %v532_v27 = vadd.f32 %v531_v20, %v526_v24 }
 0x26d   :  { %v514_v28 = vrot.slane %v513_v26, 4  ;;  %v533_v29 = vadd.f32 %v532_v27, %v527_v25 }
 0x26f   :  { %v515_v30 = vadd.f32 %v514_v28, %v513_v26  ;;  %v534_v32 = vrot.slane %v533_v29, 4 }
 0x271   :  { %v516_v34 = vrot.slane %v515_v30, 2  ;;  %v535_v35 = vadd.f32 %v534_v32, %v533_v29 }
 0x273   :  { %v517_v36 = vadd.f32 %v516_v34, %v515_v30  ;;  %v536_v37 = vrot.slane %v535_v35, 2 }
 0x275   :  { %v518_v38 = vrot.slane %v517_v36, 1  ;;  %v537_v40 = vadd.f32 %v536_v37, %v535_v35 }
 0x277   :  { %v519_v41 = vadd.f32 %v518_v38, %v517_v36  ;;  %v538_v42 = vrot.slane %v537_v40, 1 }
 0x279   :  { %v520_v18 = vmul.f32 0.02, %v519_v41  ;;  %v539_v43 = vadd.f32 %v538_v42, %v537_v40 }
 0x27b   :  { %v540_v45 = vmul.f32 0.02, %v539_v43  ;;  %v541_v46 = vmul.f32 %v520_v18, %v520_v18 }
 0x27d   :  { %v542_v47 = vsub.f32 %v540_v45, %v541_v46 }
 0x27f   :  { %v543_v4 = vmax.f32 %v542_v47, 0.0 }
 0x281   :  { %v544_v49 = vadd.f32 1e-05, %v543_v4 }
 0x283   :  { %795 = vrsqrt.f32 %v544_v49 }
 0x28d   :  { %v796_v52 = vpop.eup %795 }
 0x28e   :  { %v547_v53 = vmul.f32 %v796_v52, %v546_v51 }
 0x290   :  { %v549_v31 = vmul.f32 %v547_v53, %v520_v18  ;;  %v555_v33 = vrot.slane %v547_v53, %v1040_v50 }
 0x292   :  { %v550_v39 = vsub.f32 %v548_v55, %v549_v31  ;;  %v557_v44 = vmul.f32 %v555_v33, %v494_v63  ;;  %v558_v48 = vmul.f32 %v555_v33, %v495_v5  ;;  %v559_v54 = vmul.f32 %v555_v33, %v496_v6 }
 0x293   :  { %v560_v56 = vmul.f32 %v555_v33, %v497_v7  ;;  %v561_v58 = vmul.f32 %v555_v33, %v498_v9  ;;  %v562_v60 = vmul.f32 %v555_v33, %v499_v10  ;;  %v563_v61 = vmul.f32 %v555_v33, %v500_v11 }
 0x294   :  { %v568_v62 = vrot.slane %v550_v39, %v1040_v50 }
 0x296   :  { %v570_v0 = vadd.f32 %v568_v62, %v557_v44  ;;  %v571_v2 = vadd.f32 %v568_v62, %v558_v48  ;;  %v572_v3 = vadd.f32 %v568_v62, %v559_v54  ;;  %v573_v12 = vadd.f32 %v568_v62, %v560_v56 }
 0x297   :  { %v574_v13 = vadd.f32 %v568_v62, %v561_v58  ;;  %v575_v15 = vadd.f32 %v568_v62, %v562_v60  ;;  %v576_v16 = vadd.f32 %v568_v62, %v563_v61 }
 0x298   :  { %577 = vst [vmem:[%s1123_s9] sm:$0xff] %v570_v0  ;;  %578 = vst [vmem:[%s1123_s9 + $0x8] sm:$0xff] %v571_v2 }
 0x299   :  { %579 = vst [vmem:[%s1123_s9 + $0x10] sm:$0xff] %v572_v3  ;;  %580 = vst [vmem:[%s1123_s9 + $0x18] sm:$0xff] %v573_v12 }
 0x29a   :  { %581 = vst [vmem:[%s1123_s9 + $0x20] sm:$0xff] %v574_v13  ;;  %582 = vst [vmem:[%s1123_s9 + $0x28] sm:$0xff] %v575_v15 }
 0x29b   :  { %583 = vst [vmem:[%s1123_s9 + $0x30] sm:$0xff] %v576_v16 }

</bundles_post_ra>
